<compile_context>
chip_gen: v7x
topology: tpu7x:2x2x1
jax: 0.10.0
libtpu: 0.0.40
codegen_flags: <defaults>
</compile_context>

<pallas_src>
import functools

import jax
import jax.numpy as jnp
from jax.experimental import pallas as pl
from jax.experimental.pallas import tpu as pltpu


def _round_up(x, m):
    return ((x + m - 1) // m) * m


def _vmem_limit_bytes():
    # Scoped VMEM budget per generation: ~half of physical, capped at 64 MiB
    # (v5e/v6e: 128 MiB physical -> 64 MiB; v7x: 64 MiB physical -> 32 MiB).
    try:
        cap = int(pltpu.get_tpu_info().vmem_capacity_bytes)
    except Exception:
        cap = 64 * 1024 * 1024
    return max(32 * 1024 * 1024, min(64 * 1024 * 1024, cap // 2))


def looc_kernel(x_ref, w_ref, xsq_ref, o_ref, wsq_ref):
    # x_ref:   (tm, tk)   w_ref: (tk, tn)   xsq_ref: (tm, 1)
    # o_ref:   (tm, tn) f32 output; doubles as the matmul accumulator
    # wsq_ref: (1, tn)  f32 VMEM scratch accumulating per-column ||w||^2
    k = pl.program_id(2)

    @pl.when(k == 0)
    def _():
        o_ref[...] = jnp.zeros_like(o_ref)
        wsq_ref[...] = jnp.zeros_like(wsq_ref)

    w = w_ref[...]
    # MXU: partial x @ w into the resident output tile.
    o_ref[...] += jnp.dot(x_ref[...], w, preferred_element_type=jnp.float32)
    # VPU/XLU (cheap vs. the matmul): partial column norms from the tile
    # that is already in VMEM -- no extra HBM pass over W.
    wsq_ref[...] += jnp.sum(w * w, axis=0, keepdims=True)

    @pl.when(k == pl.num_programs(2) - 1)
    def _():
        dist_sq = xsq_ref[...] + wsq_ref[...] - 2.0 * o_ref[...]
        # Cancellation in the expansion can make dist_sq slightly negative.
        dist_sq = jnp.maximum(dist_sq, 0.0)
        o_ref[...] = jnp.sqrt(dist_sq).astype(o_ref.dtype)


@functools.partial(jax.jit, static_argnames=("tile_m", "tile_n", "tile_k"))
def looc_layer_forward(x, weight, *, tile_m=512, tile_n=1024, tile_k=512):
    """x: (B, in_dim) float32, weight: (1, in_dim, out_dim) float32."""
    B, Din = x.shape
    _, Din_w, Dout = weight.shape
    assert Din == Din_w, f"in_dim mismatch: {Din} vs {Din_w}"

    x = x.astype(jnp.float32)
    w2d = weight[0].astype(jnp.float32)  # (Din, Dout)

    # ---- Tile sizing (MXU-friendly, capped by the padded problem size) ----
    if B >= 128:
        tm = min(tile_m, _round_up(B, 128))   # align to MXU dimension
    else:
        tm = min(tile_m, _round_up(B, 8))     # tiny batch stays tiny
    tn_full = _round_up(Dout, 128)
    tn = min(tile_n, tn_full)
    tk = min(tile_k, _round_up(Din, 128))

    Bp = _round_up(B, tm)
    # v7x megacore: if the batch axis has a single block, split the output
    # axis into >= 2 blocks so both TensorCores get parallel work.
    if (Bp // tm == 1) and (tn >= tn_full) and (tn_full >= 256):
        tn = _round_up(tn_full // 2, 128)
    Dout_p = _round_up(Dout, tn)
    Din_p = _round_up(Din, tk)

    # ---- Norms from UNPADDED data; pad only the tiny vector ----
    xsq = jnp.sum(x * x, axis=-1, keepdims=True)  # (B, 1)

    # ---- Zero-pad only when required (shapes are static at trace time) ----
    # Zero padding along Din is exact for the ||x||^2 + ||w||^2 - 2 x.w
    # expansion; padded batch rows / output columns are sliced off below.
    x_p = x if (Bp, Din_p) == (B, Din) else jnp.pad(
        x, ((0, Bp - B), (0, Din_p - Din)))
    w_p = w2d if (Din_p, Dout_p) == (Din, Dout) else jnp.pad(
        w2d, ((0, Din_p - Din), (0, Dout_p - Dout)))
    xsq_p = xsq if Bp == B else jnp.pad(xsq, ((0, Bp - B), (0, 0)))

    grid = (Bp // tm, Dout_p // tn, Din_p // tk)

    cost = pl.CostEstimate(
        flops=2 * Bp * Din_p * Dout_p          # matmul
        + 2 * (Bp // tm) * Din_p * Dout_p      # in-kernel ||w||^2
        + 3 * Bp * Dout_p,                     # epilogue
        transcendentals=Bp * Dout_p,           # sqrt
        bytes_accessed=4 * (Bp * Din_p + Din_p * Dout_p + Bp * Dout_p + Bp),
    )

    out_p = pl.pallas_call(
        looc_kernel,
        out_shape=jax.ShapeDtypeStruct((Bp, Dout_p), jnp.float32),
        grid_spec=pltpu.PrefetchScalarGridSpec(
            num_scalar_prefetch=0,
            grid=grid,
            in_specs=[
                pl.BlockSpec((tm, tk), lambda i, j, k: (i, k)),
                pl.BlockSpec((tk, tn), lambda i, j, k: (k, j)),
                pl.BlockSpec((tm, 1), lambda i, j, k: (i, 0)),
            ],
            out_specs=pl.BlockSpec((tm, tn), lambda i, j, k: (i, j)),
            scratch_shapes=[pltpu.VMEM((1, tn), jnp.float32)],
        ),
        compiler_params=pltpu.CompilerParams(
            dimension_semantics=("parallel", "parallel", "arbitrary"),
            vmem_limit_bytes=_vmem_limit_bytes(),
        ),
        cost_estimate=cost,
    )(x_p, w_p, xsq_p)

    if (Bp, Dout_p) != (B, Dout):
        out_p = out_p[:B, :Dout]
    return out_p


if __name__ == "__main__":
    key = jax.random.PRNGKey(0)
    k_x, k_w = jax.random.split(key)

    B, in_dim, out_dim = 8, 32, 128

    # Deterministic kaiming-normal-like init for weight (1, in_dim, out_dim).
    # kaiming_normal_ (fan_in mode, default) -> std = sqrt(2 / fan_in).
    fan_in = in_dim
    std = (2.0 / fan_in) ** 0.5
    weight = std * jax.random.normal(k_w, (1, in_dim, out_dim), dtype=jnp.float32)

    x = jax.random.normal(k_x, (B, in_dim), dtype=jnp.float32)

    out = looc_layer_forward(x, weight)
    out = jax.block_until_ready(out)

    # Pure-JAX reference check (same math as the PyTorch module).
    ref = jnp.sqrt(jnp.sum((x[:, :, None] - weight) ** 2, axis=1))
    assert out.shape == (B, out_dim)
    assert jnp.allclose(out, ref, atol=1e-5, rtol=1e-5)

    print("KERNEL_OK")
</pallas_src>

<mosaic_0001>
module attributes {stable_mosaic.version = 11 : i64} {
  func.func @looc_kernel(%arg0: i32, %arg1: i32, %arg2: i32, %arg3: memref<8x128xf32, #tpu.memory_space<vmem>>, %arg4: memref<128x128xf32, #tpu.memory_space<vmem>>, %arg5: memref<8x1xf32, #tpu.memory_space<vmem>>, %arg6: memref<8x128xf32, #tpu.memory_space<vmem>>, %arg7: memref<1x128xf32, #tpu.memory_space<vmem>>) attributes {dimension_semantics = [#tpu.dimension_semantics<parallel>, #tpu.dimension_semantics<parallel>, #tpu.dimension_semantics<arbitrary>], iteration_bounds = array<i64: 1, 1, 1>, scalar_prefetch = 0 : i64, scratch_operands = 1 : i64, tpu.core_type = #tpu.core_type<tc>, window_params = [{transform_indices = @transform_0, window_bounds = array<i64: 8, 128>}, {transform_indices = @transform_1, window_bounds = array<i64: 128, 128>}, {transform_indices = @transform_2, window_bounds = array<i64: 8, 1>}, {transform_indices = @transform_3, window_bounds = array<i64: 8, 128>}]} {
    %c0_i32 = arith.constant 0 : i32
    %0 = arith.cmpi eq, %arg2, %c0_i32 : i32
    %1 = arith.extui %0 : i1 to i32
    %c0_i32_0 = arith.constant 0 : i32
    %2 = arith.cmpi ne, %1, %c0_i32_0 : i32
    scf.if %2 {
      %cst_15 = arith.constant 0.000000e+00 : f32
      %18 = vector.broadcast %cst_15 : f32 to vector<8x128xf32>
      %c0_16 = arith.constant 0 : index
      %c0_17 = arith.constant 0 : index
      %19 = vector.load %arg6[%c0_16, %c0_17] : memref<8x128xf32, #tpu.memory_space<vmem>>, vector<8x128xf32>
      tpu.vector_store %arg6[%c0_16, %c0_17], %18 {strides = array<i32>} : memref<8x128xf32, #tpu.memory_space<vmem>>, vector<8x128xf32>,
      %cst_18 = arith.constant 0.000000e+00 : f32
      %20 = vector.broadcast %cst_18 : f32 to vector<1x128xf32>
      %c0_19 = arith.constant 0 : index
      %c0_20 = arith.constant 0 : index
      %21 = vector.load %arg7[%c0_19, %c0_20] : memref<1x128xf32, #tpu.memory_space<vmem>>, vector<1x128xf32>
      tpu.vector_store %arg7[%c0_19, %c0_20], %20 {strides = array<i32>} : memref<1x128xf32, #tpu.memory_space<vmem>>, vector<1x128xf32>,
    } else {
    }
    %c0 = arith.constant 0 : index
    %c0_1 = arith.constant 0 : index
    %3 = vector.load %arg4[%c0, %c0_1] : memref<128x128xf32, #tpu.memory_space<vmem>>, vector<128x128xf32>
    %c0_2 = arith.constant 0 : index
    %c0_3 = arith.constant 0 : index
    %4 = vector.load %arg6[%c0_2, %c0_3] : memref<8x128xf32, #tpu.memory_space<vmem>>, vector<8x128xf32>
    %c0_4 = arith.constant 0 : index
    %c0_5 = arith.constant 0 : index
    %5 = vector.load %arg3[%c0_4, %c0_5] : memref<8x128xf32, #tpu.memory_space<vmem>>, vector<8x128xf32>
    %cst = arith.constant dense<0.000000e+00> : vector<8x128xf32>
    %6 = tpu.matmul %5, %3, %cst {dimension_numbers = #tpu.dot_dimension_numbers<[1], [0], [0], [1], [0, 0, 1, 1], [], []>} : vector<8x128xf32>, vector<128x128xf32>, vector<8x128xf32> -> vector<8x128xf32>
    %7 = arith.addf %4, %6 : vector<8x128xf32>
    %c0_6 = arith.constant 0 : index
    %c0_7 = arith.constant 0 : index
    %8 = vector.load %arg6[%c0_6, %c0_7] : memref<8x128xf32, #tpu.memory_space<vmem>>, vector<8x128xf32>
    tpu.vector_store %arg6[%c0_6, %c0_7], %7 {strides = array<i32>} : memref<8x128xf32, #tpu.memory_space<vmem>>, vector<8x128xf32>,
    %c0_8 = arith.constant 0 : index
    %c0_9 = arith.constant 0 : index
    %9 = vector.load %arg7[%c0_8, %c0_9] : memref<1x128xf32, #tpu.memory_space<vmem>>, vector<1x128xf32>
    %10 = arith.mulf %3, %3 : vector<128x128xf32>
    %cst_10 = arith.constant dense<0.000000e+00> : vector<128xf32>
    %11 = vector.multi_reduction <add>, %10, %cst_10 [0] : vector<128x128xf32> to vector<128xf32>
    %12 = vector.shape_cast %11 : vector<128xf32> to vector<1x128xf32>
    %13 = arith.addf %9, %12 : vector<1x128xf32>
    %c0_11 = arith.constant 0 : index
    %c0_12 = arith.constant 0 : index
    %14 = vector.load %arg7[%c0_11, %c0_12] : memref<1x128xf32, #tpu.memory_space<vmem>>, vector<1x128xf32>
    tpu.vector_store %arg7[%c0_11, %c0_12], %13 {strides = array<i32>} : memref<1x128xf32, #tpu.memory_space<vmem>>, vector<1x128xf32>,
    %c0_i32_13 = arith.constant 0 : i32
    %15 = arith.cmpi eq, %arg2, %c0_i32_13 : i32
    %16 = arith.extui %15 : i1 to i32
    %c0_i32_14 = arith.constant 0 : i32
    %17 = arith.cmpi ne, %16, %c0_i32_14 : i32
    scf.if %17 {
      %c0_15 = arith.constant 0 : index
      %c0_16 = arith.constant 0 : index
      %18 = vector.load %arg5[%c0_15, %c0_16] : memref<8x1xf32, #tpu.memory_space<vmem>>, vector<8x1xf32>
      %c0_17 = arith.constant 0 : index
      %c0_18 = arith.constant 0 : index
      %19 = vector.load %arg7[%c0_17, %c0_18] : memref<1x128xf32, #tpu.memory_space<vmem>>, vector<1x128xf32>
      %20 = vector.broadcast %18 : vector<8x1xf32> to vector<8x128xf32>
      %21 = vector.broadcast %19 : vector<1x128xf32> to vector<8x128xf32>
      %22 = arith.addf %20, %21 : vector<8x128xf32>
      %c0_19 = arith.constant 0 : index
      %c0_20 = arith.constant 0 : index
      %23 = vector.load %arg6[%c0_19, %c0_20] : memref<8x128xf32, #tpu.memory_space<vmem>>, vector<8x128xf32>
      %cst_21 = arith.constant 2.000000e+00 : f32
      %24 = vector.broadcast %cst_21 : f32 to vector<8x128xf32>
      %25 = arith.mulf %24, %23 : vector<8x128xf32>
      %26 = arith.subf %22, %25 : vector<8x128xf32>
      %cst_22 = arith.constant 0.000000e+00 : f32
      %27 = vector.broadcast %cst_22 : f32 to vector<8x128xf32>
      %28 = arith.maximumf %26, %27 : vector<8x128xf32>
      %29 = math.sqrt %28 : vector<8x128xf32>
      %c0_23 = arith.constant 0 : index
      %c0_24 = arith.constant 0 : index
      %30 = vector.load %arg6[%c0_23, %c0_24] : memref<8x128xf32, #tpu.memory_space<vmem>>, vector<8x128xf32>
      tpu.vector_store %arg6[%c0_23, %c0_24], %29 {strides = array<i32>} : memref<8x128xf32, #tpu.memory_space<vmem>>, vector<8x128xf32>,
    } else {
    }
    return
  }
  func.func @transform_0(%arg0: i32, %arg1: i32, %arg2: i32) -> (i32, i32) {
    %c0_i32 = arith.constant 0 : i32
    return %arg0, %arg2 : i32, i32
  }
  func.func @transform_1(%arg0: i32, %arg1: i32, %arg2: i32) -> (i32, i32) {
    %c0_i32 = arith.constant 0 : i32
    return %arg2, %arg1 : i32, i32
  }
  func.func @transform_2(%arg0: i32, %arg1: i32, %arg2: i32) -> (i32, i32) {
    %c0_i32 = arith.constant 0 : i32
    %c0_i32_0 = arith.constant 0 : i32
    return %arg0, %c0_i32 : i32, i32
  }
  func.func @transform_3(%arg0: i32, %arg1: i32, %arg2: i32) -> (i32, i32) {
    %c0_i32 = arith.constant 0 : i32
    return %arg0, %arg1 : i32, i32
  }
}

</mosaic_0001>

<bundles_post_ra>
// kernel: looc_layer_forward.1
= control target key start
LH: loop header
LB: loop body
LE: loop exit
PB: predicated region body
PF: predicated region fallthrough
CT: control target
= control target key end

     0   :  { %v303_v3 = vmov 0.0|0.0   ;;  %v304_v9 = vmov 0.0   ;;  %vm305_vm0 = vmmov 0   ;;  %s402_s0 = inlined_call_operand.vmem [shape: f32[8,128], index: 0, kind: input, shape index: {}]   ;;  %s403_s1 = inlined_call_operand.vmem [shape: f32[128,128], index: 1, kind: input, shape index: {}]   ;;  %s404_s2 = inlined_call_operand.vmem [shape: f32[8,1], index: 2, kind: input, shape index: {}]   ;;  %s405_s3 = inlined_call_operand.hbm [shape: f32[8,128], index: 3, kind: output, shape index: {}]  }
   0x1   :  { %v21_v0 = vld [vmem:[%s403_s1] sm:$0xff]  ;;  %v22_v1 = vld [vmem:[%s403_s1 + $0x8] sm:$0xff]  ;;  %v23_v2 = vld [vmem:[%s403_s1 + $0x10] sm:$0xff]  ;;  %247 = vmatprep.subr.bf16.mxu0 %v303_v3  ;;  %20 = vst [vmem:[#allocation2] sm:$0x1] %v304_v9  ;;  %244 = vmatprep.mubr.msk.f32.mxu0 %vm305_vm0, %v304_v9 }
   0x2   :  { %v248_v4 = vpack.c.bf16 %v22_v1, %v21_v0  ;;  %v112_v5 = vmul.f32 %v21_v0, %v21_v0  ;;  %v113_v6 = vmul.f32 %v22_v1, %v22_v1  ;;  %v24_v7 = vld [vmem:[%s403_s1 + $0x18] sm:$0xff]  ;;  %v114_v8 = vmul.f32 %v23_v2, %v23_v2  ;;  %v25_v13 = vld [vmem:[%s403_s1 + $0x20] sm:$0xff]  ;;  %v26_v14 = vld [vmem:[%s403_s1 + $0x28] sm:$0xff] }
   0x3   :  { %v251_v11 = vpack.c.bf16 %v24_v7, %v23_v2  ;;  %v115_v12 = vmul.f32 %v24_v7, %v24_v7  ;;  %v116_v16 = vmul.f32 %v25_v13, %v25_v13  ;;  %v154_v17 = vld [vmem:[%s404_s2] sm:$0xff] }
   0x4   :  { %249 = vmatpush3.bf16.msra.mxu0 %v248_v4  ;;  %v128_v10 = vadd.f32 %v113_v6, %v112_v5 }
   0x5   :  { %250 = vmatprep.subr.bf16.mxu0 %v303_v3 }
   0x6   :  { %v129_v15 = vadd.f32 %v128_v10, %v114_v8 }
   0x7   :  { %8 = vsyncpa [#allocation4], 0  ;;  %v254_v19 = vpack.c.bf16 %v26_v14, %v25_v13  ;;  %v117_v20 = vmul.f32 %v26_v14, %v26_v14  ;;  %v27_v21 = vld [vmem:[%s403_s1 + $0x30] sm:$0xff]  ;;  %v28_v22 = vld [vmem:[%s403_s1 + $0x38] sm:$0xff]  ;;  %v306_v23 = vmov 0  }
   0x8   :  { %252 = vmatpush3.bf16.msra.mxu0 %v251_v11  ;;  %v130_v18 = vadd.f32 %v129_v15, %v115_v12  ;;  %276 = vset.pattern.permute.xlu0 %v306_v23  ;;  %v118_v25 = vmul.f32 %v27_v21, %v27_v21  ;;  %v257_v27 = vpack.c.bf16 %v28_v22, %v27_v21  ;;  %v29_v29 = vld [vmem:[%s403_s1 + $0x40] sm:$0xff]  ;;  %v30_v30 = vld [vmem:[%s403_s1 + $0x48] sm:$0xff]  ;;  %v31_v36 = vld [vmem:[%s403_s1 + $0x50] sm:$0xff] }
   0x9   :  { %253 = vmatprep.subr.bf16.mxu0 %v303_v3  ;;  %158 = vperm.xlu0 %276, %v154_v17   ;;  %v119_v28 = vmul.f32 %v28_v22, %v28_v22  ;;  %v120_v32 = vmul.f32 %v29_v29, %v29_v29  ;;  %v260_v34 = vpack.c.bf16 %v30_v30, %v29_v29  ;;  %v32_v37 = vld [vmem:[%s403_s1 + $0x58] sm:$0xff]  ;;  %v33_v43 = vld [vmem:[%s403_s1 + $0x60] sm:$0xff]  ;;  %v34_v44 = vld [vmem:[%s403_s1 + $0x68] sm:$0xff] }
   0xa   :  { %v131_v24 = vadd.f32 %v130_v18, %v116_v16  ;;  %v121_v35 = vmul.f32 %v30_v30, %v30_v30  ;;  %v122_v39 = vmul.f32 %v31_v36, %v31_v36  ;;  %v263_v41 = vpack.c.bf16 %v32_v37, %v31_v36  ;;  %v35_v50 = vld [vmem:[%s403_s1 + $0x70] sm:$0xff]  ;;  %v36_v51 = vld [vmem:[%s403_s1 + $0x78] sm:$0xff]  ;;  %v38_v59 = vld [vmem:[%s402_s0] sm:$0xff]  ;;  %s307_s0 = smov [#allocation3]  }
   0xb   :  { %v123_v42 = vmul.f32 %v32_v37, %v32_v37  ;;  %v124_v46 = vmul.f32 %v33_v43, %v33_v43  ;;  %v266_v48 = vpack.c.bf16 %v34_v44, %v33_v43  ;;  %v125_v49 = vmul.f32 %v34_v44, %v34_v44  ;;  %v111_v1 = vld [vmem:[#allocation2] sm:$0x1]  ;;  %s186_s1 = sshll.u32 %s307_s0, 4  ;;  %s187_s1 = int_to_ptr.vmem [resolvable:$true] %s186_s1 }
   0xc   :  { %255 = vmatpush3.bf16.msra.mxu0 %v254_v19  ;;  %v132_v26 = vadd.f32 %v131_v24, %v117_v20  ;;  %v126_v53 = vmul.f32 %v35_v50, %v35_v50  ;;  %v269_v55 = vpack.c.bf16 %v36_v51, %v35_v50  ;;  %v127_v56 = vmul.f32 %v36_v51, %v36_v51  ;;  %s279_s20 = scalar_lea.vmem %s187_s1, 128  ;;  %p284_p1 = scmp.lt.s32.totalorder %s187_s1, %s187_s1 }
   0xd   :  { %256 = vmatprep.subr.bf16.mxu0 %v303_v3  ;;  %p280_p0 = scmp.ne.s32.totalorder %s187_s1, %s279_s20  ;;  %p285_p2 = scmp.lt.s32.totalorder %s279_s20, %s279_s20 }
   0xe   :  { %v133_v31 = vadd.f32 %v132_v26, %v118_v25 }
   0xf   :  { %p286_p3 = por %p285_p2, %p284_p1 }
  0x10   :  { %258 = vmatpush3.bf16.msra.mxu0 %v257_v27  ;;  %v134_v33 = vadd.f32 %v133_v31, %v119_v28 }
  0x11   :  { %259 = vmatprep.subr.bf16.mxu0 %v303_v3  ;;  %p287_p4 = pnand %p286_p3, %p280_p0 }
  0x12   :  { %v135_v38 = vadd.f32 %v134_v33, %v120_v32 }
  0x14   :  { %261 = vmatpush3.bf16.msra.mxu0 %v260_v34  ;;  %v136_v40 = vadd.f32 %v135_v38, %v121_v35 }
  0x15   :  { %262 = vmatprep.subr.bf16.mxu0 %v303_v3 }
  0x16   :  { %v137_v45 = vadd.f32 %v136_v40, %v122_v39 }
  0x18   :  { %264 = vmatpush3.bf16.msra.mxu0 %v263_v41  ;;  %v138_v47 = vadd.f32 %v137_v45, %v123_v42 }
  0x19   :  { %265 = vmatprep.subr.bf16.mxu0 %v303_v3 }
  0x1a   :  { %v139_v52 = vadd.f32 %v138_v47, %v124_v46 }
  0x1c   :  { %267 = vmatpush3.bf16.msra.mxu0 %v266_v48  ;;  %v140_v54 = vadd.f32 %v139_v52, %v125_v49 }
  0x1d   :  { %268 = vmatprep.subr.bf16.mxu0 %v303_v3 }
  0x1e   :  { %v141_v57 = vadd.f32 %v140_v54, %v126_v53 }
  0x20   :  { %270 = vmatpush3.bf16.msra.mxu0 %v269_v55  ;;  %v142_v58 = vadd.f32 %v141_v57, %v127_v56 }
  0x22   :  { %v143_v60 = vrot.slane %v142_v58, 4 }
  0x23   :  { %245 = vmatmul.mubr.f32.vlgmr.msra.gmra.mrb[0].mxu0 %v38_v59 }
  0x24   :  { %v144_v61 = vadd.f32 %v143_v60, %v142_v58 }
  0x26   :  { %v145_v62 = vrot.slane %v144_v61, 2 }
  0x28   :  { %v146_v63 = vadd.f32 %v145_v62, %v144_v61 }
  0x2a   :  { %v147_v0 = vrot.slane %v146_v63, 1 }
  0x2c   :  { %v148_v2 = vadd.f32 %v147_v0, %v146_v63 }
  0x2e   :  { %v149_v4 = vadd.f32 %v148_v2, %v111_v1 }
  0x30   :  { %150 = vst [vmem:[#allocation2] sm:$0x1] %v149_v4 }
  0x37   :  { %v194_v6 = vld [vmem:[#allocation2] ss:$0 sm:$0xff] }
  0x88   :  { %v159_v5 = vpop.permute.xlu0 %158 }
  0x89   :  { %v167_v8 = vadd.f32 %v194_v6, %v159_v5 }
  0xf6   :  { %v105_v3 = vpop.f32.mrb[0].mxu0 }
  0xf7   :  { %v246_v7 = vpop.f32.mrb[1].mxu0  ;;  %v169_v9 = vmul.f32 2.0, %v105_v3 }
  0xf9   :  { %v170_v10 = vsub.f32 %v167_v8, %v169_v9 }
  0xfb   :  { %v171_v11 = vmax.f32 %v170_v10, 0.0 }
  0xfd   :  { %277 = vrsqrt.f32 %v171_v11  ;;  %vm174_vm1 = vcmp.eq.f32.partialorder %v171_v11, inf  ;;  %v177_v14 = vand.u32 2147483648, %v171_v11  ;;  %vm176_vm2 = vcmp.eq.f32.partialorder %v171_v11, 0.0 }
 0x107   :  { %v278_v12 = vpop.eup %277 }
 0x108   :  { %v173_v13 = vmul.f32 %v278_v12, %v171_v11 }
 0x10a   :  { %v175_v15 = vsel %vm174_vm1, %v171_v11, %v173_v13 }
 0x10b   :  { %v178_v16 = vsel %vm176_vm2, %v177_v14, %v175_v15 }
 0x10c   :  { %179 = vst [vmem:[#allocation3] sm:$0xff] %v178_v16 }
 0x10d   :  { %290 = shalt.err (!%p287_p4)
}
 0x10e   :  { %s291_s23 = scalar_lea.hbm %s405_s3, 128 }
 0x10f   :  { %p292_p5 = scmp.ne.s32.totalorder %s405_s3, %s291_s23  ;;  %p295_p6 = scmp.lt.u32.totalorder %s291_s23, %s405_s3 }
 0x111   :  { %p297_p7 = pnand %p295_p6, %p292_p5 }
 0x113   :  { %300 = shalt.err (!%p297_p7)
}
 0x114   :  { %189 = dma.vmem_to_hbm [thread:$0]  %s187_s1, 128, %s405_s3, [#allocation4]  }
 0x115   :  { %301 = dma.done.wait [#allocation4], 128  }
 0x116   :  { %302 = vsyncadd [#allocation4], 4294967168 }
 0x117   :  { %193 = vsyncpa [#allocation4], 1 }

</bundles_post_ra>
